<compile_context>
chip_gen: v5e
topology: v5e:2x2
jax: 0.10.0
libtpu: 0.0.40
codegen_flags: <defaults>
</compile_context>

<pallas_src>
import functools

import jax
import jax.numpy as jnp
from jax.experimental import pallas as pl
from jax.experimental.pallas import tpu as pltpu


def _round_up(a, b):
    return (a + b - 1) // b * b


def _round_down(a, b):
    return a // b * b


def _catavgmax_kernel(x_ref, out_ref, sum_sc, max_sc, *, true_s, ts, mask_tail):
    k = pl.program_id(1)
    k_last = pl.num_programs(1) - 1

    @pl.when(k == 0)
    def _init():
        sum_sc[...] = jnp.zeros_like(sum_sc)
        max_sc[...] = jnp.full_like(max_sc, -jnp.inf)

    def _accumulate(x_sum, x_max):
        # f32 accumulation dtype fused into the reduction (no whole-tile upcast).
        sum_sc[...] += jnp.sum(x_sum, axis=-1, keepdims=True, dtype=jnp.float32)
        max_sc[...] = jnp.maximum(
            max_sc[...],
            jnp.max(x_max, axis=-1, keepdims=True).astype(jnp.float32),
        )

    if mask_tail:
        # Only the last spatial tile has out-of-bounds lanes (undefined data in
        # the boundary block); interior tiles take the cheap unmasked path.
        @pl.when(k != k_last)
        def _interior():
            x = x_ref[...]
            _accumulate(x, x)

        @pl.when(k == k_last)
        def _tail():
            x = x_ref[...]
            col = jax.lax.broadcasted_iota(jnp.int32, x.shape, 1) + k * ts
            valid = col < true_s
            _accumulate(
                jnp.where(valid, x, jnp.zeros_like(x)),
                jnp.where(valid, x, jnp.full_like(x, -jnp.inf)),
            )
    else:
        x = x_ref[...]
        _accumulate(x, x)

    @pl.when(k == k_last)
    def _finalize():
        inv_s = jnp.float32(1.0 / true_s)
        avg = (sum_sc[...] * inv_s).astype(out_ref.dtype)
        mx = max_sc[...].astype(out_ref.dtype)
        out_ref[...] = jnp.concatenate([avg, mx], axis=-1)   # (TR, 2)


def adaptive_catavgmax_pool3d(x, output_size=1, *, block_bytes=8 * 1024 * 1024):
    """x: (N, C, D, H, W). Returns (N, 2*C, 1, 1, 1)."""
    # TODO(synk): only output_size=1 (global pooling) is implemented here.
    assert output_size == 1, "Pallas kernel implements output_size=1 only"
    assert jnp.issubdtype(x.dtype, jnp.floating), (
        "floating dtype required (-inf max init/mask)"
    )
    N, C, D, H, W = x.shape
    NC = N * C
    S = D * H * W
    x2d = x.reshape(NC, S)
    itemsize = jnp.dtype(x.dtype).itemsize

    # --- row tile: no over-padding; >= 2 row tiles whenever NC > 8 so the
    # "parallel" row axis can be sharded across v7x's two TensorCores.
    n_row_tiles = max(2, pl.cdiv(NC, 256))
    TR = min(_round_up(pl.cdiv(NC, n_row_tiles), 8), _round_up(NC, 8))

    # --- spatial tile: sized by bytes (lane-aligned), capped at the array.
    S_al = _round_up(S, 128)
    TS = max(128, min(S_al, _round_down(block_bytes // (TR * itemsize), 128)))
    mask_tail = (S % TS) != 0

    grid = (pl.cdiv(NC, TR), pl.cdiv(S, TS))

    kernel = functools.partial(
        _catavgmax_kernel, true_s=S, ts=TS, mask_tail=mask_tail
    )

    out2 = pl.pallas_call(
        kernel,
        out_shape=jax.ShapeDtypeStruct((NC, 2), x.dtype),
        grid_spec=pltpu.PrefetchScalarGridSpec(
            num_scalar_prefetch=0,
            grid=grid,
            in_specs=[pl.BlockSpec((TR, TS), lambda i, k: (i, k))],
            out_specs=pl.BlockSpec((TR, 2), lambda i, k: (i, 0)),
            scratch_shapes=[
                pltpu.VMEM((TR, 1), jnp.float32),   # running sum
                pltpu.VMEM((TR, 1), jnp.float32),   # running max
            ],
        ),
        compiler_params=pltpu.CompilerParams(
            dimension_semantics=("parallel", "arbitrary"),
            vmem_limit_bytes=32 * 1024 * 1024,
        ),
        cost_estimate=pl.CostEstimate(
            flops=2 * NC * S,
            transcendentals=0,
            bytes_accessed=NC * S * itemsize + NC * 2 * itemsize,
        ),
    )(x2d)

    avg = out2[:, 0].reshape(N, C, 1, 1, 1)
    mx = out2[:, 1].reshape(N, C, 1, 1, 1)
    return jnp.concatenate([avg, mx], axis=1)


class AdaptiveCatAvgMaxPool3d:
    def __init__(self, output_size=1):
        self.output_size = output_size

    def __call__(self, x, **kwargs):
        return adaptive_catavgmax_pool3d(x, self.output_size, **kwargs)


def _reference(x):
    ref_avg = jnp.mean(x, axis=(2, 3, 4), keepdims=True)
    ref_max = jnp.max(x, axis=(2, 3, 4), keepdims=True)
    return jnp.concatenate([ref_avg, ref_max], axis=1)


if __name__ == "__main__":
    pool = AdaptiveCatAvgMaxPool3d(output_size=1)

    # Case 1: aligned small shape (single tile, no masking).
    key = jax.random.PRNGKey(0)
    N, C, D, H, W = 2, 4, 4, 8, 8
    x = jax.random.normal(key, (N, C, D, H, W), dtype=jnp.float32)
    out = jax.block_until_ready(pool(x))
    ref = _reference(x)
    assert out.shape == (N, 2 * C, 1, 1, 1), out.shape
    assert jnp.allclose(out, ref, atol=1e-5, rtol=1e-5), "mismatch (aligned)"

    # Case 2: unaligned rows + spatial tail (boundary blocks in both dims).
    key2 = jax.random.PRNGKey(1)
    N2, C2, D2, H2, W2 = 1, 3, 3, 7, 7
    x2 = jax.random.normal(key2, (N2, C2, D2, H2, W2), dtype=jnp.float32)
    out2 = jax.block_until_ready(pool(x2))
    ref2 = _reference(x2)
    assert out2.shape == (N2, 2 * C2, 1, 1, 1), out2.shape
    assert jnp.allclose(out2, ref2, atol=1e-5, rtol=1e-5), "mismatch (padded tail)"

    # Case 3: small block_bytes forces multiple spatial tiles + row tiles,
    # exercising the interior (unmasked) / tail (masked) accumulation split.
    key3 = jax.random.PRNGKey(2)
    N3, C3, D3, H3, W3 = 2, 8, 5, 9, 9
    x3 = jax.random.normal(key3, (N3, C3, D3, H3, W3), dtype=jnp.float32)
    out3 = jax.block_until_ready(pool(x3, block_bytes=8 * 1024))
    ref3 = _reference(x3)
    assert out3.shape == (N3, 2 * C3, 1, 1, 1), out3.shape
    assert jnp.allclose(out3, ref3, atol=1e-5, rtol=1e-5), "mismatch (multi-tile)"

    print("KERNEL_OK")
</pallas_src>

<mosaic_0001>
module attributes {stable_mosaic.version = 11 : i64} {
  func.func @_catavgmax_kernel(%arg0: i32, %arg1: i32, %arg2: memref<8x256xf32, #tpu.memory_space<vmem>>, %arg3: memref<8x2xf32, #tpu.memory_space<vmem>>, %arg4: memref<8x1xf32, #tpu.memory_space<vmem>>, %arg5: memref<8x1xf32, #tpu.memory_space<vmem>>) attributes {dimension_semantics = [#tpu.dimension_semantics<parallel>, #tpu.dimension_semantics<arbitrary>], iteration_bounds = array<i64: 1, 1>, scalar_prefetch = 0 : i64, scratch_operands = 2 : i64, tpu.core_type = #tpu.core_type<tc>, window_params = [{transform_indices = @transform_0, window_bounds = array<i64: 8, 256>}, {transform_indices = @transform_1, window_bounds = array<i64: 8, 2>}]} {
    %c0_i32 = arith.constant 0 : i32
    %0 = arith.cmpi eq, %arg1, %c0_i32 : i32
    %1 = arith.extui %0 : i1 to i32
    %c0_i32_0 = arith.constant 0 : i32
    %2 = arith.cmpi ne, %1, %c0_i32_0 : i32
    scf.if %2 {
      %cst_13 = arith.constant 0.000000e+00 : f32
      %17 = vector.broadcast %cst_13 : f32 to vector<8x1xf32>
      %c0_14 = arith.constant 0 : index
      %c0_15 = arith.constant 0 : index
      %18 = vector.load %arg4[%c0_14, %c0_15] : memref<8x1xf32, #tpu.memory_space<vmem>>, vector<8x1xf32>
      tpu.vector_store %arg4[%c0_14, %c0_15], %17 {strides = array<i32>} : memref<8x1xf32, #tpu.memory_space<vmem>>, vector<8x1xf32>,
      %cst_16 = arith.constant 0xFF800000 : f32
      %19 = vector.broadcast %cst_16 : f32 to vector<8x1xf32>
      %c0_17 = arith.constant 0 : index
      %c0_18 = arith.constant 0 : index
      %20 = vector.load %arg5[%c0_17, %c0_18] : memref<8x1xf32, #tpu.memory_space<vmem>>, vector<8x1xf32>
      tpu.vector_store %arg5[%c0_17, %c0_18], %19 {strides = array<i32>} : memref<8x1xf32, #tpu.memory_space<vmem>>, vector<8x1xf32>,
    } else {
    }
    %c0 = arith.constant 0 : index
    %c0_1 = arith.constant 0 : index
    %3 = vector.load %arg2[%c0, %c0_1] : memref<8x256xf32, #tpu.memory_space<vmem>>, vector<8x256xf32>
    %c0_2 = arith.constant 0 : index
    %c0_3 = arith.constant 0 : index
    %4 = vector.load %arg4[%c0_2, %c0_3] : memref<8x1xf32, #tpu.memory_space<vmem>>, vector<8x1xf32>
    %cst = arith.constant dense<0.000000e+00> : vector<8xf32>
    %5 = vector.multi_reduction <add>, %3, %cst [1] : vector<8x256xf32> to vector<8xf32>
    %6 = vector.shape_cast %5 : vector<8xf32> to vector<8x1xf32>
    %7 = arith.addf %4, %6 : vector<8x1xf32>
    %c0_4 = arith.constant 0 : index
    %c0_5 = arith.constant 0 : index
    %8 = vector.load %arg4[%c0_4, %c0_5] : memref<8x1xf32, #tpu.memory_space<vmem>>, vector<8x1xf32>
    tpu.vector_store %arg4[%c0_4, %c0_5], %7 {strides = array<i32>} : memref<8x1xf32, #tpu.memory_space<vmem>>, vector<8x1xf32>,
    %c0_6 = arith.constant 0 : index
    %c0_7 = arith.constant 0 : index
    %9 = vector.load %arg5[%c0_6, %c0_7] : memref<8x1xf32, #tpu.memory_space<vmem>>, vector<8x1xf32>
    %cst_8 = arith.constant dense<0xFF800000> : vector<8xf32>
    %10 = vector.multi_reduction <maximumf>, %3, %cst_8 [1] : vector<8x256xf32> to vector<8xf32>
    %11 = vector.shape_cast %10 : vector<8xf32> to vector<8x1xf32>
    %12 = arith.maximumf %9, %11 : vector<8x1xf32>
    %c0_9 = arith.constant 0 : index
    %c0_10 = arith.constant 0 : index
    %13 = vector.load %arg5[%c0_9, %c0_10] : memref<8x1xf32, #tpu.memory_space<vmem>>, vector<8x1xf32>
    tpu.vector_store %arg5[%c0_9, %c0_10], %12 {strides = array<i32>} : memref<8x1xf32, #tpu.memory_space<vmem>>, vector<8x1xf32>,
    %c0_i32_11 = arith.constant 0 : i32
    %14 = arith.cmpi eq, %arg1, %c0_i32_11 : i32
    %15 = arith.extui %14 : i1 to i32
    %c0_i32_12 = arith.constant 0 : i32
    %16 = arith.cmpi ne, %15, %c0_i32_12 : i32
    scf.if %16 {
      %c0_13 = arith.constant 0 : index
      %c0_14 = arith.constant 0 : index
      %17 = vector.load %arg4[%c0_13, %c0_14] : memref<8x1xf32, #tpu.memory_space<vmem>>, vector<8x1xf32>
      %cst_15 = arith.constant 3.906250e-03 : f32
      %18 = vector.broadcast %cst_15 : f32 to vector<8x1xf32>
      %19 = arith.mulf %17, %18 : vector<8x1xf32>
      %c0_16 = arith.constant 0 : index
      %c0_17 = arith.constant 0 : index
      %20 = vector.load %arg5[%c0_16, %c0_17] : memref<8x1xf32, #tpu.memory_space<vmem>>, vector<8x1xf32>
      %21 = tpu.concatenate %19, %20 in 1 : vector<8x1xf32>, vector<8x1xf32> -> vector<8x2xf32>
      %c0_18 = arith.constant 0 : index
      %c0_19 = arith.constant 0 : index
      %22 = vector.load %arg3[%c0_18, %c0_19] : memref<8x2xf32, #tpu.memory_space<vmem>>, vector<8x2xf32>
      tpu.vector_store %arg3[%c0_18, %c0_19], %21 {strides = array<i32>} : memref<8x2xf32, #tpu.memory_space<vmem>>, vector<8x2xf32>,
    } else {
    }
    return
  }
  func.func @transform_0(%arg0: i32, %arg1: i32) -> (i32, i32) {
    %c0_i32 = arith.constant 0 : i32
    return %arg0, %arg1 : i32, i32
  }
  func.func @transform_1(%arg0: i32, %arg1: i32) -> (i32, i32) {
    %c0_i32 = arith.constant 0 : i32
    %c0_i32_0 = arith.constant 0 : i32
    return %arg0, %c0_i32 : i32, i32
  }
}

</mosaic_0001>

<bundles_post_ra>
// kernel: tpu_custom_call.1
= control target key start
LH: loop header
LB: loop body
LE: loop exit
PB: predicated region body
PF: predicated region fallthrough
CT: control target
= control target key end

     0   :  { %6 = vsyncpa [#allocation5], 0  ;;  %s92_s9 = smov [#allocation4]   ;;  %s117_s0 = inlined_call_operand.hbm [shape: f32[8,256], index: 0, kind: input, shape index: {}]   ;;  %s118_s1 = inlined_call_operand.vmem [shape: f32[8,2], index: 1, kind: output, shape index: {}]  }
   0x1   :  { %s12_s8 = sshll.u32 %s117_s0, 4  ;;  %s14_s10 = sshll.u32 %s92_s9, 4  ;;  %s13_s8 = int_to_ptr.hbm [resolvable:$true] %s12_s8  ;;  %s15_s10 = int_to_ptr.vmem [resolvable:$true] %s14_s10 }
   0x2   :  { %17 = dma.hbm_to_vmem [thread:$0]  %s13_s8, 256, %s15_s10, [#allocation5]  }
   0x3   :  { %90 = dma.done.wait [#allocation5], 256  }
   0x4   :  { %91 = vsyncadd [#allocation5], 4294967040  ;;  %vm26_vm0 = vcmask 7168   ;;  %v93_v0 = vmov -inf   ;;  %v29_v1 = vld [vmem:[#allocation4] sm:$0xff]  ;;  %v30_v2 = vld [vmem:[#allocation4 + $0x8] sm:$0xff] }
   0x5   :  { %28 = vst.msk [vmem:[#allocation3] sm:$0xff] %vm26_vm0, %v93_v0  ;;  %v39_v3 = vmax.f32 %v29_v1, %v30_v2  ;;  %v32_v4 = vadd.f32 %v30_v2, %v29_v1  ;;  %v94_v5 = vmov 0.0   ;;  %s95_s0 = smov 1   ;;  %vm55_vm1 = vcmask 15360  }
   0x6   :  { %27 = vst.msk [vmem:[#allocation2] sm:$0xff] %vm26_vm0, %v94_v5 }
   0x7   :  { %40 = vmax.xlane.f32.xlu0 %v39_v3 }
   0xc   :  { %v38_v6 = vld [vmem:[#allocation3] sm:$0xff] }
   0xd   :  { %v31_v9 = vld [vmem:[#allocation2] sm:$0xff] }
   0xf   :  { %33 = vadd.xlane.f32.xlu0 %v32_v4 }
  0x7a   :  { %v41_v7 = vpop.xlane.xlu0 %40 }
  0x7b   :  { %v42_v8 = vmax.f32 %v38_v6, %v41_v7 }
  0x7d   :  { %43 = vst.msk [vmem:[#allocation3] sm:$0xff] %vm26_vm0, %v42_v8 }
  0x82   :  { %v34_v10 = vpop.xlane.xlu0 %33 }
  0x83   :  { %v35_v11 = vadd.f32 %v34_v10, %v31_v9 }
  0x84   :  { %v49_v12 = vld [vmem:[#allocation3] sm:$0xff] }
  0x85   :  { %51 = vrot.lane.b32.xlu1 %v49_v12, %s95_s0  ;;  %37 = vst.msk [vmem:[#allocation2] sm:$0xff] %vm26_vm0, %v35_v11 }
  0x8c   :  { %v47_v13 = vld [vmem:[#allocation2] sm:$0xff] }
  0x8d   :  { %v48_v14 = vmul.f32 0.00390625, %v47_v13 }
  0xf7   :  { %v52_v15 = vpop.permute.xlu1 %51 }
  0xf8   :  { %v54_v16 = vsel %vm26_vm0, %v48_v14, %v52_v15 }
  0xf9   :  { %56 = vst.msk [vmem:[%s118_s1] sm:$0xff] %vm55_vm1, %v54_v16 }
  0xfa   :  { %61 = vsyncpa [#allocation5], 1 }

</bundles_post_ra>
